<compile_context>
chip_gen: v7x
topology: tpu7x:2x2x1
jax: 0.10.0
libtpu: 0.0.40
codegen_flags: <defaults>
</compile_context>

<pallas_src>
import math
import functools

import jax
import jax.numpy as jnp
from jax.experimental import pallas as pl
from jax.experimental.pallas import tpu as pltpu


# ---------------------------------------------------------------------------
# Parameter setup (pure JAX glue): build the sinusoidal `pe` buffer exactly as
# the PyTorch __init__ does.
# ---------------------------------------------------------------------------
def make_pe(max_len: int, d_model: int, dtype=jnp.float32):
    position = jnp.arange(max_len, dtype=jnp.float32)[:, None]            # (L, 1)
    div_term = jnp.exp(
        jnp.arange(0, d_model, 2, dtype=jnp.float32) * -(math.log(10000.0) / d_model)
    )                                                                      # (D/2,)
    ang = position * div_term                                              # (L, D/2)
    pe = jnp.zeros((max_len, d_model), jnp.float32)
    pe = pe.at[:, 0::2].set(jnp.sin(ang))
    pe = pe.at[:, 1::2].set(jnp.cos(ang))
    return pe.astype(dtype)


# ---------------------------------------------------------------------------
# Pallas kernels
# ---------------------------------------------------------------------------
def _pe_add_kernel(x_ref, pe_ref, o_ref):
    # eval-mode forward: x + pe[:, :S]  (dropout is identity in eval)
    # x_ref: (1, TS, D), pe_ref: (TS, D) -> broadcast add
    o_ref[...] = (x_ref[...] + pe_ref[...]).astype(o_ref.dtype)


def _hash_u32(h):
    # lowbias32-style integer finalizer (uint32, wrapping arithmetic)
    h = h ^ (h >> jnp.uint32(16))
    h = h * jnp.uint32(0x7FEB352D)
    h = h ^ (h >> jnp.uint32(15))
    h = h * jnp.uint32(0x846CA68B)
    h = h ^ (h >> jnp.uint32(16))
    return h


def _pe_add_dropout_kernel(seed_ref, x_ref, pe_ref, o_ref, *, rate, ts, d):
    # training-mode forward: inverted dropout(x + pe)
    s = pl.program_id(0)
    b = pl.program_id(1)
    n_s = pl.num_programs(0)

    y = x_ref[...] + pe_ref[...]                                   # (1, TS, D)

    # Counter-based per-element PRNG: hash(global element index, seed).
    block_id = (b * n_s + s).astype(jnp.uint32)
    base = block_id * jnp.uint32(ts * d)
    row = jax.lax.broadcasted_iota(jnp.int32, (1, ts, d), 1).astype(jnp.uint32)
    col = jax.lax.broadcasted_iota(jnp.int32, (1, ts, d), 2).astype(jnp.uint32)
    idx = base + row * jnp.uint32(d) + col
    seed = seed_ref[0].astype(jnp.uint32)
    h = _hash_u32(idx + seed * jnp.uint32(0x9E3779B9))

    # Integer threshold on the top 24 bits (kept in signed-positive range).
    bits24 = (h >> jnp.uint32(8)).astype(jnp.int32)                # [0, 2^24)
    thresh = jnp.int32(min(int(round(rate * (1 << 24))), (1 << 24) - 1))
    keep = bits24 >= thresh                                        # P(keep) = 1 - rate

    scale = jnp.asarray(1.0 / (1.0 - rate), dtype=y.dtype)
    o_ref[...] = jnp.where(keep, y * scale, jnp.zeros_like(y)).astype(o_ref.dtype)


# ---------------------------------------------------------------------------
# Wrapper
# ---------------------------------------------------------------------------
def _choose_tile_rows(S, D, itemsize):
    # sublane packing: 8 rows for 4-byte, 16 for 2-byte, 32 for 1-byte dtypes
    row_align = max(8, 32 // max(1, itemsize))
    s_pad = ((S + row_align - 1) // row_align) * row_align
    target_bytes = 2 * 1024 * 1024                    # ~2 MiB per (TS, D) block
    ts = max(row_align, min(1024, target_bytes // max(1, D * itemsize)))
    ts = (ts // row_align) * row_align
    return min(ts, s_pad)


def positional_encoding(x, pe, *, dropout_rate=0.1, train=False, seed=0):
    B, S, D = x.shape
    if pe.dtype != x.dtype:
        pe = pe.astype(x.dtype)                       # keep pe DMA bytes = x dtype

    itemsize = jnp.dtype(x.dtype).itemsize
    ts = _choose_tile_rows(S, D, itemsize)
    n_s = pl.cdiv(S, ts)
    block_bytes = ts * D * itemsize
    vmem_limit = int(min(64 << 20, max(32 << 20, 10 * block_bytes)))

    cparams = pltpu.CompilerParams(
        dimension_semantics=("parallel", "parallel"),
        vmem_limit_bytes=vmem_limit,
    )

    if (not train) or dropout_rate == 0.0:
        return pl.pallas_call(
            _pe_add_kernel,
            out_shape=jax.ShapeDtypeStruct((B, S, D), x.dtype),
            grid_spec=pltpu.PrefetchScalarGridSpec(
                num_scalar_prefetch=0,
                grid=(n_s, B),                                   # S-tile outer, batch inner
                in_specs=[
                    pl.BlockSpec((1, ts, D), lambda s, b: (b, s, 0)),
                    pl.BlockSpec((ts, D), lambda s, b: (s, 0)),  # pe resident across batch
                ],
                out_specs=pl.BlockSpec((1, ts, D), lambda s, b: (b, s, 0)),
            ),
            compiler_params=cparams,
        )(x, pe)

    kernel = functools.partial(
        _pe_add_dropout_kernel, rate=float(dropout_rate), ts=ts, d=D
    )
    seed_arr = jnp.array([seed], dtype=jnp.int32)
    return pl.pallas_call(
        kernel,
        out_shape=jax.ShapeDtypeStruct((B, S, D), x.dtype),
        grid_spec=pltpu.PrefetchScalarGridSpec(
            num_scalar_prefetch=1,
            grid=(n_s, B),
            in_specs=[
                pl.BlockSpec((1, ts, D), lambda s, b, seed: (b, s, 0)),
                pl.BlockSpec((ts, D), lambda s, b, seed: (s, 0)),
            ],
            out_specs=pl.BlockSpec((1, ts, D), lambda s, b, seed: (b, s, 0)),
        ),
        compiler_params=cparams,
    )(seed_arr, x, pe)


if __name__ == "__main__":
    B, S, D = 2, 8, 32        # batch, seq, d_model (small shapes)
    MAX_LEN = 64

    key = jax.random.PRNGKey(0)
    x = jax.random.normal(key, (B, S, D), dtype=jnp.float32)
    pe = make_pe(MAX_LEN, D)

    # Eval-mode forward (dropout = identity): must match x + pe[:S] exactly.
    out_eval = positional_encoding(x, pe, dropout_rate=0.1, train=False)
    jax.block_until_ready(out_eval)
    ref = x + pe[None, :S, :]
    assert jnp.allclose(out_eval, ref, atol=1e-6), "eval-mode mismatch"

    # Training-mode forward (inverted dropout, in-kernel counter-based PRNG).
    rate = 0.1
    out_train = positional_encoding(x, pe, dropout_rate=rate, train=True, seed=42)
    jax.block_until_ready(out_train)
    assert out_train.shape == (B, S, D)
    # every output element is either 0 (dropped) or (x+pe)/(1-rate) (kept)
    ref_scaled = ref / (1.0 - rate)
    ok = jnp.isclose(out_train, 0.0, atol=1e-6) | jnp.isclose(
        out_train, ref_scaled, atol=1e-5
    )
    assert bool(jnp.all(ok)), "training-mode dropout values inconsistent"

    print("KERNEL_OK")
</pallas_src>

<mosaic_0001>
module attributes {stable_mosaic.version = 11 : i64} {
  func.func @_pe_add_kernel(%arg0: i32, %arg1: i32, %arg2: memref<1x8x32xf32, #tpu.memory_space<vmem>>, %arg3: memref<8x32xf32, #tpu.memory_space<vmem>>, %arg4: memref<1x8x32xf32, #tpu.memory_space<vmem>>) attributes {dimension_semantics = [#tpu.dimension_semantics<parallel>, #tpu.dimension_semantics<parallel>], iteration_bounds = array<i64: 1, 2>, scalar_prefetch = 0 : i64, scratch_operands = 0 : i64, tpu.core_type = #tpu.core_type<tc>, window_params = [{transform_indices = @transform_0, window_bounds = array<i64: 1, 8, 32>}, {transform_indices = @transform_1, window_bounds = array<i64: 8, 32>}, {transform_indices = @transform_2, window_bounds = array<i64: 1, 8, 32>}]} {
    %c0 = arith.constant 0 : index
    %c0_0 = arith.constant 0 : index
    %c0_1 = arith.constant 0 : index
    %0 = vector.load %arg2[%c0, %c0_0, %c0_1] : memref<1x8x32xf32, #tpu.memory_space<vmem>>, vector<1x8x32xf32>
    %c0_2 = arith.constant 0 : index
    %c0_3 = arith.constant 0 : index
    %1 = vector.load %arg3[%c0_2, %c0_3] : memref<8x32xf32, #tpu.memory_space<vmem>>, vector<8x32xf32>
    %2 = vector.shape_cast %1 : vector<8x32xf32> to vector<1x8x32xf32>
    %3 = arith.addf %0, %2 : vector<1x8x32xf32>
    %c0_4 = arith.constant 0 : index
    %c0_5 = arith.constant 0 : index
    %c0_6 = arith.constant 0 : index
    %4 = vector.load %arg4[%c0_4, %c0_5, %c0_6] : memref<1x8x32xf32, #tpu.memory_space<vmem>>, vector<1x8x32xf32>
    tpu.vector_store %arg4[%c0_4, %c0_5, %c0_6], %3 {strides = array<i32>} : memref<1x8x32xf32, #tpu.memory_space<vmem>>, vector<1x8x32xf32>,
    return
  }
  func.func @transform_0(%arg0: i32, %arg1: i32) -> (i32, i32, i32) {
    %c0_i32 = arith.constant 0 : i32
    %c0_i32_0 = arith.constant 0 : i32
    return %arg1, %arg0, %c0_i32 : i32, i32, i32
  }
  func.func @transform_1(%arg0: i32, %arg1: i32) -> (i32, i32) {
    %c0_i32 = arith.constant 0 : i32
    %c0_i32_0 = arith.constant 0 : i32
    return %arg0, %c0_i32 : i32, i32
  }
  func.func @transform_2(%arg0: i32, %arg1: i32) -> (i32, i32, i32) {
    %c0_i32 = arith.constant 0 : i32
    %c0_i32_0 = arith.constant 0 : i32
    return %arg1, %arg0, %c0_i32 : i32, i32, i32
  }
}

</mosaic_0001>

<bundles_post_ra>
// kernel: tpu_custom_call.1
= control target key start
LH: loop header
LB: loop body
LE: loop exit
PB: predicated region body
PF: predicated region fallthrough
CT: control target
= control target key end

     0   :  { %7 = vsyncpa [#allocation3], 0  ;;  %s565_s0 = inlined_call_operand.vmem [shape: f32[2,8,32], index: 0, kind: input, shape index: {}]   ;;  %s566_s1 = inlined_call_operand.vmem [shape: f32[64,32], index: 1, kind: input, shape index: {}]   ;;  %s567_s2 = inlined_call_operand.hbm [shape: f32[2,8,32], index: 2, kind: output, shape index: {}]  }
   0x1   :  { %9 = vsyncpa [#allocation3 + $0x1], 0  ;;  %s450_s9 = smov 0   ;;  %s452_s10 = smov 0  }
   0x2   :  { %s454_s11 = smov 0   ;;  %s456_s12 = smov 0  }
   0x3   :  { %s458_s13 = smov 0   ;;  %s460_s14 = smov 0  }
   0x4 LB: > { %s287_s15 = sadd.s32 4294967295, %s432_s14   ;;  %s288_s16 = sadd.s32 4294967294, %s432_s14   ;;  %s432_s14 = sphi %s460_s14, %s15_s14   ;;  %s428_s13 = sphi %s458_s13, %s574_s13   ;;  %s424_s12 = sphi %s456_s12, %s573_s12   ;;  %s420_s11 = sphi %s454_s11, %s572_s11   ;;  %s416_s10 = sphi %s452_s10, %s571_s10   ;;  %s412_s9 = sphi %s450_s9, %s570_s9  }
   0x5   : > { %s24_s17 = sadd.s32 1, %s428_s13  ;;  %s90_s18 = sadd.s32 1, %s420_s11 }
   0x6   : > { %p25_p0 = scmp.ge.s32.totalorder %s24_s17, 2  ;;  %p100_p1 = scmp.ne.s32.totalorder %s420_s11, %s416_s10 }
   0x7   : > { %p101_p2 = scmp.eq.s32.totalorder %s287_s15, 1  ;;  %p106_p3 = scmp.ne.s32.totalorder %s416_s10, %s412_s9 }
   0x8   : > { %s576_s17 = smov (%p25_p0, %s24_s17), 0  ;;  %p107_p5 = scmp.eq.s32.totalorder %s288_s16, 1 }
   0x9   : > { %p490_p4 = por %p101_p2, %p100_p1  ;;  %s85_s20 = ssub.s32 %s428_s13, %s576_s17 }
   0xa   : > { %p292_p6 = scmp.ge.s32.totalorder %s432_s14, 1  ;;  %p88_p7 = scmp.eq.s32.totalorder %s85_s20, 0 }
   0xb   : > { %p497_p8 = por %p107_p5, %p106_p3  ;;  %p142_p9 = scmp.lt.s32.totalorder %s432_s14, 3 }
   0xc   : > { %s503_s22 = scalar_select %p88_p7, %s420_s11, %s90_s18  }
   0xd   : > { %p143_p10 = pnand %p292_p6, %p142_p9 }
   0xe   : > { %s167_s23 = sand.u32 (!%p143_p10), 1, %s416_s10   ;;  %p170_p11 = scmp.lt.s32.totalorder (!%p143_p10), %s424_s12, 1  ;;  %v182_v0 = vld [vmem:[%s566_s1] sm:$0xff] (!%p143_p10)  ;;  %vm184_vm0 = vcmask (!%p143_p10), 261120  }
   0xf   : > { %146 = sbr.rel (%p143_p10) target bundleno = 43 (0x2b), region = 28  ;;  %s293_s24 = sshll.u32 (!%p143_p10), %s167_s23, 3 }
  0x10   : > { %s296_s26 = sshll.u32 (!%p143_p10), %s424_s12, 7  ;;  %s169_s30 = scalar_lea.vmem (!%p143_p10), [#allocation2], %s293_s24 }
  0x11   : > { %s201_s3 = sshll.u32 (!%p143_p10), %s169_s30, 4  ;;  %s187_s15 = scalar_lea.sflag (!%p143_p10), [#allocation3], %s167_s23  ;;  %s515_s3 = int_to_ptr.vmem [resolvable:$true] %s201_s3 }
  0x12   : > { %s354_s16 = scalar_lea.vmem (!%p143_p10), %s515_s3, 128  ;;  %s434_s18 = smov (!%p143_p10), [#allocation2]  }
  0x13   : > { %p355_p12 = scmp.ne.s32.totalorder (!%p143_p10), %s515_s3, %s354_s16  ;;  %s358_s20 = sshll.u32 (!%p143_p10), %s434_s18, 4  ;;  %s359_s20 = int_to_ptr.vmem [resolvable:$false] %s358_s20 }
  0x14   : > { %s360_s24 = scalar_lea.vmem (!%p143_p10), %s359_s20, 256  ;;  %p361_p1 = scmp.lt.s32.totalorder (!%p143_p10), %s515_s3, %s359_s20 }
  0x15   : > { %p356_p13 = pnand (!%p143_p10), %p355_p12, %p490_p4  ;;  %p362_p2 = scmp.lt.s32.totalorder (!%p143_p10), %s360_s24, %s354_s16 }
  0x16   : > { %s171_s25 = scalar_select %p170_p11, %s424_s12, 1 }
  0x17   : > { %s520_s12 = scalar_lea.hbm %s567_s2, %s296_s26  ;;  %p357_p0 = pneg %p356_p13 }
  0x18   : > { %s294_s27 = sshll.u32 %s171_s25, 3  ;;  %p363_p3 = por %p362_p2, %p361_p1 }
  0x19   : > { %s176_s6 = scalar_lea.vmem %s565_s0, %s294_s27 }
  0x1a   : > { %v181_v1 = vld [vmem:[%s176_s6] sm:$0xff]  ;;  %p364_p5 = pnand %p363_p3, %p357_p0 }
  0x1b   : > { %v183_v2 = vadd.f32 %v182_v0, %v181_v1 }
  0x1d   : > { %185 = vst.msk [vmem:[%s169_s30] sm:$0xff] %vm184_vm0, %v183_v2 }
  0x1e   : > { %367 = shalt.err (!%p364_p5)
}
  0x1f   : > { %s368_s23 = scalar_lea.hbm %s520_s12, 128  ;;  %s372_s27 = scalar_lea.hbm %s567_s2, 256 }
  0x20   : > { %p369_p6 = scmp.ne.s32.totalorder %s520_s12, %s368_s23  ;;  %p373_p10 = scmp.lt.u32.totalorder %s520_s12, %s567_s2 }
  0x21   : > { %p374_p11 = scmp.lt.u32.totalorder %s372_s27, %s368_s23  ;;  %p376_p13 = scmp.lt.u32.totalorder %s368_s23, %s520_s12 }
  0x22   : > { %p370_p7 = pnand %p369_p6, %p490_p4 }
  0x23   : > { %p375_p12 = por %p374_p11, %p373_p10 }
  0x24   : > { %p371_p9 = pneg %p370_p7 }
  0x25   : > { %p377_p0 = por %p376_p13, %p375_p12 }
  0x27   : > { %p378_p1 = pnand %p377_p0, %p371_p9 }
  0x29   : > { %381 = shalt.err (!%p378_p1)
}
  0x2a   : > { %299 = dma.vmem_to_hbm [thread:$0]  (%p490_p4), %s515_s3, 128, %s520_s12, %s187_s15  }
  0x2b PF: > { %p305_p2 = scmp.ge.s32.totalorder %s432_s14, 2  ;;  %s213_s30 = sand.u32 1, %s412_s9  }
  0x2c   : > { %s214_s4 = scalar_lea.sflag [#allocation3], %s213_s30 }
  0x2d   : > { %p302_p3 = pnand %p305_p2, %p497_p8 }
  0x2f   : > { %407 = dma.done.wait (!%p302_p3), %s214_s4, 128  }
  0x30   : > { %409 = vsyncadd (!%p302_p3), %s214_s4, 4294967168  ;;  %s15_s14 = sadd.s32 1, %s432_s14   ;;  %s570_s9 = smov %s416_s10 }
  0x31   : > { %p12_p5 = scmp.ge.s32.totalorder %s15_s14, 4   ;;  %s571_s10 = smov %s420_s11 }
  0x32   : > { %s572_s11 = smov %s503_s22  ;;  %s573_s12 = smov %s428_s13 }
  0x33   : > { %s574_s13 = smov %s576_s17  ;;  %14 = sbr.rel (!%p12_p5) target bundleno = 4 (0x4), region = 66 }
  0x3a   :  { %219 = vsyncpa [#allocation3], 1 }
  0x3b   :  { %221 = vsyncpa [#allocation3 + $0x1], 1 }

</bundles_post_ra>
